<compile_context>
chip_gen: v5e
topology: v5e:2x2
jax: 0.10.0
libtpu: 0.0.40
codegen_flags: <defaults>
</compile_context>

<pallas_src>
import jax
import jax.numpy as jnp
from jax.experimental import pallas as pl
from jax.experimental.pallas import tpu as pltpu


def _sub_kernel(lanes_ref, x_ref, out_ref):
    # lanes_ref: (1, rows_blk, 128) tile of the flattened lanes.
    # x_ref:     (1, 1, 128) lane-dense agent position, VMEM-resident across
    #            the chunk axis; broadcasts along the sublane/row axis.
    # out_ref:   (1, rows_blk, 128) tile, promoted dtype.
    out_ref[...] = lanes_ref[...].astype(out_ref.dtype) - x_ref[...]


def _pick_rows_blk(rows, itemsize, batch):
    """Rows per block: ~2 MiB nominal per streaming operand, 8-multiple."""
    budget_rows = max(8, (2 * 1024 * 1024) // (128 * itemsize))
    rb = min(rows, budget_rows)
    # Keep >= 2 grid steps available for v7x megacore sharding when the batch
    # axis alone does not provide parallel steps.
    if batch == 1 and rows >= 16:
        rb = min(rb, max(8, rows // 2))
    if rb < rows:
        rb = max(8, (rb // 8) * 8)
    return rb


def incremental_forward(x, lanes, *, rows_blk=None, use_pallas=None):
    """JAX/Pallas equivalent of incremental.forward.

    x:     (B, 1, 1, D)  agent position (broadcastable against lanes)
    lanes: (B, L, P, D)  lane points
    returns: (B, 1, L*P*D)  == (lanes - x).view(B, -1).unsqueeze(1)
    """
    # TODO(synk): the original PyTorch forward ends with `pass` (returns
    # None); we return the computed/flattened tensor instead of None.
    B, L, P, D = lanes.shape
    ND = L * P * D
    out_dtype = jnp.promote_types(x.dtype, lanes.dtype)

    pallas_ok = (ND % 128 == 0) and (128 % D == 0)
    if use_pallas is None:
        # At tiny sizes a standalone pallas_call is launch-overhead bound:
        # let XLA fuse the subtraction into the consumer instead.
        use_pallas = pallas_ok and (B * ND >= (1 << 16))
    if not (use_pallas and pallas_ok):
        out = lanes.astype(out_dtype) - x.astype(out_dtype)
        return out.reshape(B, 1, ND)

    rows = ND // 128
    if rows_blk is None:
        rows_blk = _pick_rows_blk(rows, jnp.dtype(out_dtype).itemsize, B)
    assert rows_blk == rows or rows_blk % 8 == 0, (
        "rows_blk must be a multiple of 8 or the full row dim")

    # Free contiguous reshape into the sublane-rich layout.
    lanes3 = lanes.reshape(B, rows, 128)

    # Tiny lane-dense resident x block: [x, y, x, y, ...] per batch row.
    # Only B*128 elements -> negligible wrapper cost, no HBM-sized broadcast.
    x_row = jnp.broadcast_to(
        x.reshape(B, 1, D).astype(out_dtype), (B, 128 // D, D)
    ).reshape(B, 1, 128)

    grid = (B, pl.cdiv(rows, rows_blk))
    out = pl.pallas_call(
        _sub_kernel,
        out_shape=jax.ShapeDtypeStruct((B, rows, 128), out_dtype),
        grid=grid,
        in_specs=[
            pl.BlockSpec((1, rows_blk, 128), lambda b, j: (b, j, 0)),  # lanes
            pl.BlockSpec((1, 1, 128), lambda b, j: (b, 0, 0)),         # x (resident)
        ],
        out_specs=pl.BlockSpec((1, rows_blk, 128), lambda b, j: (b, j, 0)),
        compiler_params=pltpu.CompilerParams(
            dimension_semantics=("parallel", "parallel")
        ),
    )(lanes3, x_row)

    # view(B, -1).unsqueeze(1); contiguous reshape in the wrapper.
    return out.reshape(B, 1, ND)


if __name__ == "__main__":
    key = jax.random.PRNGKey(0)
    k1, k2, k3, k4 = jax.random.split(key, 4)

    # --- small demo shapes consistent with the module ---------------------
    B, L, P, D = 2, 8, 16, 2  # batch, num lanes, points per lane, xy coords
    lanes = jax.random.normal(k1, (B, L, P, D), dtype=jnp.float32)
    x = jax.random.normal(k2, (B, 1, 1, D), dtype=jnp.float32)

    ref = (lanes - x).reshape(B, -1)[:, None, :]

    # Force the Pallas path (auto-dispatch would fuse at this tiny size).
    out = jax.block_until_ready(incremental_forward(x, lanes, use_pallas=True))
    assert out.shape == (B, 1, L * P * D), out.shape
    assert jnp.allclose(out, ref, atol=1e-6), "mismatch vs reference (pallas, small)"

    # Auto-dispatch path (plain JAX / fuse-into-consumer at this size).
    out_auto = jax.block_until_ready(incremental_forward(x, lanes))
    assert jnp.allclose(out_auto, ref, atol=1e-6), "mismatch vs reference (auto)"

    # --- gridded path: exercises chunked rows + VMEM-resident x block ------
    L2, P2 = 8, 512  # ND = 8192 -> rows = 64, rows_blk = 8 -> grid (2, 8)
    lanes2 = jax.random.normal(k3, (B, L2, P2, D), dtype=jnp.float32)
    x2 = jax.random.normal(k4, (B, 1, 1, D), dtype=jnp.float32)
    ref2 = (lanes2 - x2).reshape(B, -1)[:, None, :]
    out2 = jax.block_until_ready(
        incremental_forward(x2, lanes2, rows_blk=8, use_pallas=True))
    assert out2.shape == (B, 1, L2 * P2 * D), out2.shape
    assert jnp.allclose(out2, ref2, atol=1e-6), "mismatch vs reference (gridded)"

    # --- mixed-dtype promotion (bf16 lanes, f32 x -> f32 output) -----------
    lanes_bf16 = lanes2.astype(jnp.bfloat16)
    ref3 = (lanes_bf16.astype(jnp.float32) - x2).reshape(B, -1)[:, None, :]
    out3 = jax.block_until_ready(
        incremental_forward(x2, lanes_bf16, use_pallas=True))
    assert out3.dtype == jnp.float32, out3.dtype
    assert jnp.allclose(out3, ref3, atol=1e-6), "mismatch vs reference (promotion)"

    print("KERNEL_OK")
</pallas_src>

<mosaic_0001>
module attributes {stable_mosaic.version = 11 : i64} {
  func.func @_sub_kernel(%arg0: i32, %arg1: i32, %arg2: memref<1x2x128xf32, #tpu.memory_space<vmem>>, %arg3: memref<1x1x128xf32, #tpu.memory_space<vmem>>, %arg4: memref<1x2x128xf32, #tpu.memory_space<vmem>>) attributes {dimension_semantics = [#tpu.dimension_semantics<parallel>, #tpu.dimension_semantics<parallel>], iteration_bounds = array<i64: 2, 1>, scalar_prefetch = 0 : i64, scratch_operands = 0 : i64, tpu.core_type = #tpu.core_type<tc>, window_params = [{transform_indices = @transform_0, window_bounds = array<i64: 1, 2, 128>}, {transform_indices = @transform_1, window_bounds = array<i64: 1, 1, 128>}, {transform_indices = @transform_2, window_bounds = array<i64: 1, 2, 128>}]} {
    %c0 = arith.constant 0 : index
    %c0_0 = arith.constant 0 : index
    %c0_1 = arith.constant 0 : index
    %0 = vector.load %arg2[%c0, %c0_0, %c0_1] : memref<1x2x128xf32, #tpu.memory_space<vmem>>, vector<1x2x128xf32>
    %c0_2 = arith.constant 0 : index
    %c0_3 = arith.constant 0 : index
    %c0_4 = arith.constant 0 : index
    %1 = vector.load %arg3[%c0_2, %c0_3, %c0_4] : memref<1x1x128xf32, #tpu.memory_space<vmem>>, vector<1x1x128xf32>
    %2 = vector.broadcast %1 : vector<1x1x128xf32> to vector<1x2x128xf32>
    %3 = arith.subf %0, %2 : vector<1x2x128xf32>
    %c0_5 = arith.constant 0 : index
    %c0_6 = arith.constant 0 : index
    %c0_7 = arith.constant 0 : index
    %4 = vector.load %arg4[%c0_5, %c0_6, %c0_7] : memref<1x2x128xf32, #tpu.memory_space<vmem>>, vector<1x2x128xf32>
    tpu.vector_store %arg4[%c0_5, %c0_6, %c0_7], %3 {strides = array<i32>} : memref<1x2x128xf32, #tpu.memory_space<vmem>>, vector<1x2x128xf32>,
    return
  }
  func.func @transform_0(%arg0: i32, %arg1: i32) -> (i32, i32, i32) {
    %c0_i32 = arith.constant 0 : i32
    %c0_i32_0 = arith.constant 0 : i32
    return %arg0, %arg1, %c0_i32 : i32, i32, i32
  }
  func.func @transform_1(%arg0: i32, %arg1: i32) -> (i32, i32, i32) {
    %c0_i32 = arith.constant 0 : i32
    %c0_i32_0 = arith.constant 0 : i32
    %c0_i32_1 = arith.constant 0 : i32
    return %arg0, %c0_i32, %c0_i32_0 : i32, i32, i32
  }
  func.func @transform_2(%arg0: i32, %arg1: i32) -> (i32, i32, i32) {
    %c0_i32 = arith.constant 0 : i32
    %c0_i32_0 = arith.constant 0 : i32
    return %arg0, %arg1, %c0_i32 : i32, i32, i32
  }
}

</mosaic_0001>

<bundles_post_ra>
// kernel: tpu_custom_call.1
= control target key start
LH: loop header
LB: loop body
LE: loop exit
PB: predicated region body
PF: predicated region fallthrough
CT: control target
= control target key end

     0   :  { %7 = vsyncpa [#allocation3], 0  ;;  %s710_s0 = inlined_call_operand.hbm [shape: f32[2,2,128], index: 0, kind: input, shape index: {}]   ;;  %s711_s1 = inlined_call_operand.hbm [shape: f32[2,1,128], index: 1, kind: input, shape index: {}]   ;;  %s712_s2 = inlined_call_operand.hbm [shape: f32[2,2,128], index: 2, kind: output, shape index: {}]  }
   0x1   :  { %9 = vsyncpa [#allocation3 + $0x1], 0 }
   0x2   :  { %10 = vsyncpa [#allocation6], 0 }
   0x3   :  { %12 = vsyncpa [#allocation6 + $0x1], 0 }
   0x4   :  { %13 = vsyncpa [#allocation4], 0 }
   0x5   :  { %15 = vsyncpa [#allocation4 + $0x1], 0  ;;  %s580_s9 = smov 0   ;;  %s582_s10 = smov 0  }
   0x6   :  { %s584_s11 = smov 0   ;;  %s586_s12 = smov 0  }
   0x7   :  { %s588_s13 = smov 0   ;;  %s590_s14 = smov 0  }
   0x8 LB: > { %s336_s15 = sadd.s32 4294967295, %s563_s14   ;;  %s337_s16 = sadd.s32 4294967294, %s563_s14   ;;  %s563_s14 = sphi %s590_s14, %s21_s14   ;;  %s559_s13 = sphi %s588_s13, %s721_s13   ;;  %s555_s12 = sphi %s586_s12, %s720_s12   ;;  %s551_s11 = sphi %s584_s11, %s719_s11   ;;  %s547_s10 = sphi %s582_s10, %s718_s10   ;;  %s543_s9 = sphi %s580_s9, %s717_s9  }
   0x9   : > { %s33_s17 = sadd.s32 1, %s559_s13  ;;  %s42_s18 = sadd.s32 1, %s551_s11 }
   0xa   : > { %p35_p0 = scmp.ge.s32.totalorder %s33_s17, 2  ;;  %p49_p1 = scmp.ne.s32.totalorder %s551_s11, %s547_s10 }
   0xb   : > { %p50_p2 = scmp.eq.s32.totalorder %s563_s14, 0  ;;  %p55_p3 = scmp.ne.s32.totalorder %s547_s10, %s543_s9 }
   0xc   : > { %s723_s17 = smov (%p35_p0, %s33_s17), 0  ;;  %p56_p5 = scmp.eq.s32.totalorder %s336_s15, 0 }
   0xd   : > { %p621_p4 = por %p50_p2, %p49_p1  ;;  %s37_s20 = ssub.s32 %s559_s13, %s723_s17 }
   0xe   : > { %p107_p6 = scmp.eq.s32.totalorder %s336_s15, 1  ;;  %p40_p7 = scmp.eq.s32.totalorder %s37_s20, 0 }
   0xf   : > { %p627_p8 = por %p56_p5, %p55_p3  ;;  %p113_p10 = scmp.eq.s32.totalorder %s337_s16, 1 }
  0x10   : > { %p631_p9 = por %p107_p6, %p49_p1  ;;  %p339_p12 = scmp.ge.s32.totalorder %s563_s14, 2 }
  0x11   : > { %s636_s23 = scalar_select %p40_p7, %s551_s11, %s42_s18  }
  0x12   : > { %p638_p11 = por %p113_p10, %p55_p3  ;;  %p366_p13 = scmp.lt.s32.totalorder %s563_s14, 2 }
  0x13   : > { %s133_s25 = sand.u32 1, %s551_s11   ;;  %s341_s27 = sshll.u32 %s559_s13, 1 }
  0x14   : > { %s340_s26 = sshll.u32 %s133_s25, 1  ;;  %s142_s30 = scalar_lea.hbm %s710_s0, %s341_s27 }
  0x15   : > { %s137_s3 = scalar_lea.vmem [#allocation2], %s340_s26  ;;  %s144_s5 = sshll.u32 %s142_s30, 4  ;;  %s145_s5 = int_to_ptr.hbm [resolvable:$true] %s144_s5 }
  0x16   : > { %s146_s4 = sshll.u32 %s137_s3, 4  ;;  %p356_p0 = pnand %p366_p13, %p621_p4  ;;  %s147_s4 = int_to_ptr.vmem [resolvable:$true] %s146_s4 }
  0x17   : > { %p342_p1 = scmp.ge.s32.totalorder %s563_s14, 1  ;;  %p168_p2 = scmp.lt.s32.totalorder %s563_s14, 3 }
  0x18   : > { %s134_s6 = scalar_lea.sflag [#allocation3], %s133_s25  ;;  %s159_s15 = scalar_lea.hbm %s711_s1, %s559_s13 }
  0x19   : > { %358 = dma.hbm_to_vmem [thread:$0]  (!%p356_p0), %s145_s5, 32, %s147_s4, %s134_s6  }
  0x1a   : > { %p169_p3 = pnand %p342_p1, %p168_p2  ;;  %s156_s16 = scalar_lea.vmem [#allocation5], %s133_s25 }
  0x1b   : > { %s163_s18 = sshll.u32 %s156_s16, 4  ;;  %s161_s20 = sshll.u32 %s159_s15, 4  ;;  %s164_s18 = int_to_ptr.vmem [resolvable:$true] %s163_s18  ;;  %s162_s20 = int_to_ptr.hbm [resolvable:$true] %s161_s20 }
  0x1c   : > { %s154_s26 = scalar_lea.sflag [#allocation6], %s133_s25  ;;  %172 = sbr.rel (%p169_p3) target bundleno = 51 (0x33), region = 28 }
  0x1d   : > { %361 = dma.hbm_to_vmem [thread:$0]  (!%p356_p0), %s162_s20, 16, %s164_s18, %s154_s26  }
  0x1e   : > { %s658_s19 = sand.u32 (!%p169_p3), 1, %s547_s10  }
  0x1f   : > { %s343_s27 = sshll.u32 (!%p169_p3), %s658_s19, 1  ;;  %s175_s28 = scalar_lea.sflag (!%p169_p3), [#allocation3], %s658_s19 }
  0x20   : > { %s178_s29 = scalar_lea.vmem (!%p169_p3), [#allocation2], %s343_s27 }
  0x21   : > { %530 = dma.done.wait (%p627_p8), %s175_s28, 32  }
  0x22   : > { %532 = vsyncadd (%p627_p8), %s175_s28, 4294967264  ;;  %s185_s25 = scalar_lea.sflag [#allocation6], %s658_s19  ;;  %s187_s30 = scalar_lea.vmem [#allocation5], %s658_s19 }
  0x23   : > { %534 = dma.done.wait (%p627_p8), %s185_s25, 16  }
  0x24   : > { %536 = vsyncadd (%p627_p8), %s185_s25, 4294967280  ;;  %s346_s3 = sshll.u32 %s555_s12, 1  ;;  %s212_s7 = scalar_lea.vmem [#allocation7], %s343_s27  ;;  %v213_v0 = vld [vmem:[%s178_s29] sm:$0x3] }
  0x25   : > { %s232_s6 = scalar_lea.hbm %s712_s2, %s346_s3  ;;  %s234_s8 = sshll.u32 %s212_s7, 4  ;;  %v416_v1 = vld [vmem:[%s187_s30] ss:$0 sm:$0xff]  ;;  %s235_s8 = int_to_ptr.vmem [resolvable:$true] %s234_s8 }
  0x26   : > { %s236_s15 = sshll.u32 %s232_s6, 4  ;;  %v218_v2 = vsub.f32 %v213_v0, %v416_v1  ;;  %s221_s16 = scalar_lea.sflag [#allocation4], %s658_s19  ;;  %s237_s15 = int_to_ptr.hbm [resolvable:$true] %s236_s15 }
  0x27   : > { %s491_s21 = sshra.s32 %s237_s15, 4  ;;  %s497_s26 = scalar_lea.hbm %s712_s2, 4  ;;  %s492_s21 = int_to_ptr.hbm [resolvable:$true] %s491_s21 }
  0x28   : > { %219 = vst [vmem:[%s212_s7] sm:$0x3] %v218_v2  ;;  %s493_s18 = scalar_lea.hbm %s492_s21, 2  ;;  %p498_p7 = scmp.lt.s32.totalorder %s492_s21, %s712_s2 }
  0x29   : > { %p494_p4 = scmp.ne.s32.totalorder %s492_s21, %s493_s18  ;;  %p499_p8 = scmp.lt.s32.totalorder %s497_s26, %s493_s18 }
  0x2b   : > { %p495_p5 = pnand %p494_p4, %p631_p9  ;;  %p500_p10 = por %p499_p8, %p498_p7 }
  0x2d   : > { %p496_p6 = pneg %p495_p5 }
  0x2f   : > { %p501_p13 = pnand %p500_p10, %p496_p6 }
  0x31   : > { %504 = shalt.err (!%p501_p13)
}
  0x32   : > { %353 = dma.vmem_to_hbm [thread:$0]  (%p631_p9), %s235_s8, 32, %s237_s15, %s221_s16  }
  0x33 PF: > { %s248_s19 = sand.u32 1, %s543_s9   ;;  %p363_p0 = pnand %p339_p12, %p638_p11 }
  0x34   : > { %s249_s29 = scalar_lea.sflag [#allocation4], %s248_s19 }
  0x35   : > { %p364_p1 = pneg %p363_p0 }
  0x37   : > { %538 = dma.done.wait (%p364_p1), %s249_s29, 32  }
  0x38   : > { %540 = vsyncadd (%p364_p1), %s249_s29, 4294967264  ;;  %s21_s14 = sadd.s32 1, %s563_s14   ;;  %s717_s9 = smov %s547_s10 }
  0x39   : > { %p18_p2 = scmp.ge.s32.totalorder %s21_s14, 4   ;;  %s718_s10 = smov %s551_s11 }
  0x3a   : > { %s719_s11 = smov %s636_s23  ;;  %s720_s12 = smov %s559_s13 }
  0x3b   : > { %s721_s13 = smov %s723_s17  ;;  %20 = sbr.rel (!%p18_p2) target bundleno = 8 (0x8), region = 86 }
  0x40   :  { %255 = vsyncpa [#allocation3], 1 }
  0x41   :  { %257 = vsyncpa [#allocation3 + $0x1], 1 }
  0x42   :  { %258 = vsyncpa [#allocation6], 1 }
  0x43   :  { %260 = vsyncpa [#allocation6 + $0x1], 1 }
  0x44   :  { %261 = vsyncpa [#allocation4], 1 }
  0x45   :  { %263 = vsyncpa [#allocation4 + $0x1], 1 }

</bundles_post_ra>
